<compile_context>
chip_gen: v7x
topology: tpu7x:2x2x1
jax: 0.10.0
libtpu: 0.0.40
codegen_flags: <defaults>
</compile_context>

<pallas_src>
import math

import jax
import jax.numpy as jnp
from jax.experimental import pallas as pl
from jax.experimental.pallas import tpu as pltpu


def _attention_kernel(sent_ref, tgt_ref,
                      wq_ref, bq_ref,
                      wk_ref, bk_ref,
                      wv_ref, bv_ref,
                      o_ref):
    """One block of TB batch rows per grid step.

    sent_ref : (TB, S, H) VMEM
    tgt_ref  : (TB, H)    VMEM
    w*_ref   : (H, H)     VMEM  (x @ W layout; wq already scaled by 1/sqrt(H))
    b*_ref   : (1, H)     VMEM  (bq already scaled by 1/sqrt(H))
    o_ref    : (TB, H)    VMEM
    """
    tb, s, h = sent_ref.shape

    sent = sent_ref[...]                       # (TB, S, H)
    tgt = tgt_ref[...]                         # (TB, H)

    wq = wq_ref[...]
    wk = wk_ref[...]
    wv = wv_ref[...]
    bq = bq_ref[...]
    bk = bk_ref[...]
    bv = bv_ref[...]

    # Q projection: (TB, H) @ (H, H). Scale 1/sqrt(H) is pre-folded into wq/bq.
    q = jnp.dot(tgt, wq, preferred_element_type=jnp.float32) + bq          # (TB, H)

    # K / V projections as one big matmul each: merge the (TB, S) leading dims.
    sent2d = sent.reshape(tb * s, h)                                        # (TB*S, H)
    k = (jnp.dot(sent2d, wk, preferred_element_type=jnp.float32) + bk
         ).reshape(tb, s, h)                                                # (TB, S, H)
    v = (jnp.dot(sent2d, wv, preferred_element_type=jnp.float32) + bv
         ).reshape(tb, s, h)                                                # (TB, S, H)

    # score[b, s] = sum_h q[b, h] * k[b, s, h]   (VPU multiply + XLU lane reduce,
    # overlaps with the MXU work; H is small here).
    score = jnp.sum(q[:, None, :] * k, axis=-1)                             # (TB, S)

    # Softmax over the sequence axis (dropout = identity in eval mode).
    m = jnp.max(score, axis=-1, keepdims=True)
    e = jnp.exp(score - m)
    denom = jnp.sum(e, axis=-1, keepdims=True)
    probs = e * pl.reciprocal(denom, approx=True)                           # (TB, S)

    # out[b, h] = sum_s probs[b, s] * v[b, s, h]   (sublane reduce over S).
    out = jnp.sum(probs[:, :, None] * v, axis=1)                            # (TB, H)
    o_ref[...] = out.astype(o_ref.dtype)


def attention_forward(sent, target, sent_mask, params, *, block_b=None):
    """sent: (B, S, H), target: (B, H), sent_mask: (B, S) [unused, matches torch]."""
    del sent_mask  # computed-but-unused in the reference forward
    B, S, H = sent.shape

    wq, bq = params["q_w"]
    wk, bk = params["k_w"]
    wv, bv = params["v_w"]

    # Fold the 1/sqrt(H) softmax scale into the Q projection (wrapper side).
    scale = 1.0 / math.sqrt(H)
    wq_s = wq * scale
    bq_s = bq * scale

    # Batch-block size: as large as possible (<=128) so MXU sublanes are filled
    # and output stores are lane/sublane-dense.
    if block_b is None:
        block_b = min(B, 128)
    n_blocks = pl.cdiv(B, block_b)
    Bp = n_blocks * block_b
    if Bp != B:
        pad = Bp - B
        sent = jnp.pad(sent, ((0, pad), (0, 0), (0, 0)))
        target = jnp.pad(target, ((0, pad), (0, 0)))

    itemsize = jnp.dtype(sent.dtype).itemsize
    w_itemsize = jnp.dtype(wq.dtype).itemsize
    # Rough resident-VMEM footprint: weights + biases + double-buffered
    # sent / target / output blocks.
    footprint = (3 * H * H + 3 * H) * w_itemsize
    footprint += 2 * (block_b * S * H + 2 * block_b * H) * itemsize
    vmem_limit = int(min(max(2 * footprint + (1 << 20), 32 << 20), 64 << 20))

    grid_spec = pltpu.PrefetchScalarGridSpec(
        num_scalar_prefetch=0,
        grid=(n_blocks,),
        in_specs=[
            pl.BlockSpec((block_b, S, H), lambda b: (b, 0, 0)),   # sent
            pl.BlockSpec((block_b, H), lambda b: (b, 0)),         # target
            pl.BlockSpec((H, H), lambda b: (0, 0)),               # wq (scaled)
            pl.BlockSpec((1, H), lambda b: (0, 0)),               # bq (scaled)
            pl.BlockSpec((H, H), lambda b: (0, 0)),               # wk
            pl.BlockSpec((1, H), lambda b: (0, 0)),               # bk
            pl.BlockSpec((H, H), lambda b: (0, 0)),               # wv
            pl.BlockSpec((1, H), lambda b: (0, 0)),               # bv
        ],
        out_specs=pl.BlockSpec((block_b, H), lambda b: (b, 0)),
    )

    out = pl.pallas_call(
        _attention_kernel,
        out_shape=jax.ShapeDtypeStruct((Bp, H), sent.dtype),
        grid_spec=grid_spec,
        compiler_params=pltpu.CompilerParams(
            dimension_semantics=("parallel",),
            vmem_limit_bytes=vmem_limit,
        ),
    )(sent, target, wq_s, bq_s, wk, bk, wv, bv)

    return out[:B]


def init_params(key, hidden_dim):
    """Deterministic nn.Linear-style init: U(-1/sqrt(H), 1/sqrt(H))."""
    bound = 1.0 / math.sqrt(hidden_dim)
    params = {}
    for name in ("q_w", "k_w", "v_w"):
        key, kw, kb = jax.random.split(key, 3)
        # stored as (H_in, H_out) so the kernel computes x @ W + b
        w = jax.random.uniform(kw, (hidden_dim, hidden_dim),
                               minval=-bound, maxval=bound, dtype=jnp.float32)
        b = jax.random.uniform(kb, (1, hidden_dim),
                               minval=-bound, maxval=bound, dtype=jnp.float32)
        params[name] = (w, b)
    return params


def _reference_forward(sent, target, sent_mask, params):
    """Pure-JAX reference mirroring the PyTorch forward (eval mode)."""
    wq, bq = params["q_w"]
    wk, bk = params["k_w"]
    wv, bv = params["v_w"]
    H = sent.shape[-1]
    q = (target @ wq + bq[0])[:, None, :]                   # (B, 1, H)
    k = sent @ wk + bk[0]                                   # (B, S, H)
    v = sent @ wv + bv[0]                                   # (B, S, H)
    score = jnp.einsum("bqh,bsh->bqs", q, k) / math.sqrt(H)
    probs = jax.nn.softmax(score, axis=-1)
    return jnp.einsum("bqs,bsh->bqh", probs, v)[:, 0, :]


if __name__ == "__main__":
    B, S, H = 2, 8, 32
    att_drop = 0.0

    key = jax.random.PRNGKey(0)
    key, k_sent, k_tgt, k_mask, k_params = jax.random.split(key, 5)

    sent = jax.random.normal(k_sent, (B, S, H), dtype=jnp.float32)
    target = jax.random.normal(k_tgt, (B, H), dtype=jnp.float32)
    sent_mask = (jax.random.uniform(k_mask, (B, S)) > 0.2).astype(jnp.float32)

    params = init_params(k_params, H)

    out = attention_forward(sent, target, sent_mask, params)
    out = jax.block_until_ready(out)

    ref = _reference_forward(sent, target, sent_mask, params)
    assert out.shape == (B, H)
    # Tolerance loosened slightly vs. f32-exact because the softmax denominator
    # uses the EUP approximate reciprocal.
    assert jnp.allclose(out, ref, atol=5e-3, rtol=5e-3), "mismatch vs reference"

    print("KERNEL_OK")
</pallas_src>

<mosaic_0001>
module attributes {stable_mosaic.version = 11 : i64} {
  func.func @_attention_kernel(%arg0: i32, %arg1: memref<2x8x32xf32, #tpu.memory_space<vmem>>, %arg2: memref<2x32xf32, #tpu.memory_space<vmem>>, %arg3: memref<32x32xf32, #tpu.memory_space<vmem>>, %arg4: memref<1x32xf32, #tpu.memory_space<vmem>>, %arg5: memref<32x32xf32, #tpu.memory_space<vmem>>, %arg6: memref<1x32xf32, #tpu.memory_space<vmem>>, %arg7: memref<32x32xf32, #tpu.memory_space<vmem>>, %arg8: memref<1x32xf32, #tpu.memory_space<vmem>>, %arg9: memref<2x32xf32, #tpu.memory_space<vmem>>) attributes {dimension_semantics = [#tpu.dimension_semantics<parallel>], iteration_bounds = array<i64: 1>, scalar_prefetch = 0 : i64, scratch_operands = 0 : i64, tpu.core_type = #tpu.core_type<tc>, window_params = [{transform_indices = @transform_0, window_bounds = array<i64: 2, 8, 32>}, {transform_indices = @transform_1, window_bounds = array<i64: 2, 32>}, {pipeline_mode = #tpu.pipeline_mode<synchronous>, transform_indices = @transform_2, window_bounds = array<i64: 32, 32>}, {pipeline_mode = #tpu.pipeline_mode<synchronous>, transform_indices = @transform_3, window_bounds = array<i64: 1, 32>}, {pipeline_mode = #tpu.pipeline_mode<synchronous>, transform_indices = @transform_4, window_bounds = array<i64: 32, 32>}, {pipeline_mode = #tpu.pipeline_mode<synchronous>, transform_indices = @transform_5, window_bounds = array<i64: 1, 32>}, {pipeline_mode = #tpu.pipeline_mode<synchronous>, transform_indices = @transform_6, window_bounds = array<i64: 32, 32>}, {pipeline_mode = #tpu.pipeline_mode<synchronous>, transform_indices = @transform_7, window_bounds = array<i64: 1, 32>}, {transform_indices = @transform_8, window_bounds = array<i64: 2, 32>}]} {
    %c0 = arith.constant 0 : index
    %c0_0 = arith.constant 0 : index
    %c0_1 = arith.constant 0 : index
    %0 = vector.load %arg1[%c0, %c0_0, %c0_1] : memref<2x8x32xf32, #tpu.memory_space<vmem>>, vector<2x8x32xf32>
    %c0_2 = arith.constant 0 : index
    %c0_3 = arith.constant 0 : index
    %1 = vector.load %arg2[%c0_2, %c0_3] : memref<2x32xf32, #tpu.memory_space<vmem>>, vector<2x32xf32>
    %c0_4 = arith.constant 0 : index
    %c0_5 = arith.constant 0 : index
    %2 = vector.load %arg3[%c0_4, %c0_5] : memref<32x32xf32, #tpu.memory_space<vmem>>, vector<32x32xf32>
    %c0_6 = arith.constant 0 : index
    %c0_7 = arith.constant 0 : index
    %3 = vector.load %arg5[%c0_6, %c0_7] : memref<32x32xf32, #tpu.memory_space<vmem>>, vector<32x32xf32>
    %c0_8 = arith.constant 0 : index
    %c0_9 = arith.constant 0 : index
    %4 = vector.load %arg7[%c0_8, %c0_9] : memref<32x32xf32, #tpu.memory_space<vmem>>, vector<32x32xf32>
    %c0_10 = arith.constant 0 : index
    %c0_11 = arith.constant 0 : index
    %5 = vector.load %arg4[%c0_10, %c0_11] : memref<1x32xf32, #tpu.memory_space<vmem>>, vector<1x32xf32>
    %c0_12 = arith.constant 0 : index
    %c0_13 = arith.constant 0 : index
    %6 = vector.load %arg6[%c0_12, %c0_13] : memref<1x32xf32, #tpu.memory_space<vmem>>, vector<1x32xf32>
    %c0_14 = arith.constant 0 : index
    %c0_15 = arith.constant 0 : index
    %7 = vector.load %arg8[%c0_14, %c0_15] : memref<1x32xf32, #tpu.memory_space<vmem>>, vector<1x32xf32>
    %cst = arith.constant dense<0.000000e+00> : vector<2x32xf32>
    %8 = tpu.matmul %1, %2, %cst {dimension_numbers = #tpu.dot_dimension_numbers<[1], [0], [0], [1], [0, 0, 1, 1], [], []>} : vector<2x32xf32>, vector<32x32xf32>, vector<2x32xf32> -> vector<2x32xf32>
    %9 = vector.broadcast %5 : vector<1x32xf32> to vector<2x32xf32>
    %10 = arith.addf %8, %9 : vector<2x32xf32>
    %11 = vector.shape_cast %0 : vector<2x8x32xf32> to vector<16x32xf32>
    %cst_16 = arith.constant dense<0.000000e+00> : vector<16x32xf32>
    %12 = tpu.matmul %11, %3, %cst_16 {dimension_numbers = #tpu.dot_dimension_numbers<[1], [0], [0], [1], [0, 0, 1, 1], [], []>} : vector<16x32xf32>, vector<32x32xf32>, vector<16x32xf32> -> vector<16x32xf32>
    %13 = vector.broadcast %6 : vector<1x32xf32> to vector<16x32xf32>
    %14 = arith.addf %12, %13 : vector<16x32xf32>
    %15 = vector.shape_cast %14 : vector<16x32xf32> to vector<2x8x32xf32>
    %cst_17 = arith.constant dense<0.000000e+00> : vector<16x32xf32>
    %16 = tpu.matmul %11, %4, %cst_17 {dimension_numbers = #tpu.dot_dimension_numbers<[1], [0], [0], [1], [0, 0, 1, 1], [], []>} : vector<16x32xf32>, vector<32x32xf32>, vector<16x32xf32> -> vector<16x32xf32>
    %17 = vector.broadcast %7 : vector<1x32xf32> to vector<16x32xf32>
    %18 = arith.addf %16, %17 : vector<16x32xf32>
    %19 = vector.shape_cast %18 : vector<16x32xf32> to vector<2x8x32xf32>
    %20 = vector.shape_cast %10 : vector<2x32xf32> to vector<2x1x32xf32>
    %21 = vector.broadcast %20 : vector<2x1x32xf32> to vector<2x8x32xf32>
    %22 = arith.mulf %21, %15 : vector<2x8x32xf32>
    %cst_18 = arith.constant dense<0.000000e+00> : vector<2x8xf32>
    %23 = vector.multi_reduction <add>, %22, %cst_18 [2] : vector<2x8x32xf32> to vector<2x8xf32>
    %cst_19 = arith.constant dense<0xFF800000> : vector<2xf32>
    %24 = vector.multi_reduction <maximumf>, %23, %cst_19 [1] : vector<2x8xf32> to vector<2xf32>
    %25 = vector.shape_cast %24 : vector<2xf32> to vector<2x1xf32>
    %26 = vector.broadcast %25 : vector<2x1xf32> to vector<2x8xf32>
    %27 = arith.subf %23, %26 : vector<2x8xf32>
    %28 = math.exp %27 : vector<2x8xf32>
    %cst_20 = arith.constant dense<0.000000e+00> : vector<2xf32>
    %29 = vector.multi_reduction <add>, %28, %cst_20 [1] : vector<2x8xf32> to vector<2xf32>
    %30 = vector.shape_cast %29 : vector<2xf32> to vector<2x1xf32>
    %31 = tpu.reciprocal %30 {approx = true} : vector<2x1xf32> -> vector<2x1xf32>
    %32 = vector.broadcast %31 : vector<2x1xf32> to vector<2x8xf32>
    %33 = arith.mulf %28, %32 : vector<2x8xf32>
    %34 = vector.shape_cast %33 : vector<2x8xf32> to vector<2x8x1xf32>
    %35 = vector.broadcast %34 : vector<2x8x1xf32> to vector<2x8x32xf32>
    %36 = arith.mulf %35, %19 : vector<2x8x32xf32>
    %cst_21 = arith.constant dense<0.000000e+00> : vector<2x32xf32>
    %37 = vector.multi_reduction <add>, %36, %cst_21 [1] : vector<2x8x32xf32> to vector<2x32xf32>
    %c0_22 = arith.constant 0 : index
    %c0_23 = arith.constant 0 : index
    %38 = vector.load %arg9[%c0_22, %c0_23] : memref<2x32xf32, #tpu.memory_space<vmem>>, vector<2x32xf32>
    tpu.vector_store %arg9[%c0_22, %c0_23], %37 {strides = array<i32>} : memref<2x32xf32, #tpu.memory_space<vmem>>, vector<2x32xf32>,
    return
  }
  func.func @transform_0(%arg0: i32) -> (i32, i32, i32) {
    %c0_i32 = arith.constant 0 : i32
    %c0_i32_0 = arith.constant 0 : i32
    %c0_i32_1 = arith.constant 0 : i32
    return %arg0, %c0_i32, %c0_i32_0 : i32, i32, i32
  }
  func.func @transform_1(%arg0: i32) -> (i32, i32) {
    %c0_i32 = arith.constant 0 : i32
    %c0_i32_0 = arith.constant 0 : i32
    return %arg0, %c0_i32 : i32, i32
  }
  func.func @transform_2(%arg0: i32) -> (i32, i32) {
    %c0_i32 = arith.constant 0 : i32
    %c0_i32_0 = arith.constant 0 : i32
    %c0_i32_1 = arith.constant 0 : i32
    return %c0_i32, %c0_i32_0 : i32, i32
  }
  func.func @transform_3(%arg0: i32) -> (i32, i32) {
    %c0_i32 = arith.constant 0 : i32
    %c0_i32_0 = arith.constant 0 : i32
    %c0_i32_1 = arith.constant 0 : i32
    return %c0_i32, %c0_i32_0 : i32, i32
  }
  func.func @transform_4(%arg0: i32) -> (i32, i32) {
    %c0_i32 = arith.constant 0 : i32
    %c0_i32_0 = arith.constant 0 : i32
    %c0_i32_1 = arith.constant 0 : i32
    return %c0_i32, %c0_i32_0 : i32, i32
  }
  func.func @transform_5(%arg0: i32) -> (i32, i32) {
    %c0_i32 = arith.constant 0 : i32
    %c0_i32_0 = arith.constant 0 : i32
    %c0_i32_1 = arith.constant 0 : i32
    return %c0_i32, %c0_i32_0 : i32, i32
  }
  func.func @transform_6(%arg0: i32) -> (i32, i32) {
    %c0_i32 = arith.constant 0 : i32
    %c0_i32_0 = arith.constant 0 : i32
    %c0_i32_1 = arith.constant 0 : i32
    return %c0_i32, %c0_i32_0 : i32, i32
  }
  func.func @transform_7(%arg0: i32) -> (i32, i32) {
    %c0_i32 = arith.constant 0 : i32
    %c0_i32_0 = arith.constant 0 : i32
    %c0_i32_1 = arith.constant 0 : i32
    return %c0_i32, %c0_i32_0 : i32, i32
  }
  func.func @transform_8(%arg0: i32) -> (i32, i32) {
    %c0_i32 = arith.constant 0 : i32
    %c0_i32_0 = arith.constant 0 : i32
    return %arg0, %c0_i32 : i32, i32
  }
}

</mosaic_0001>

<bundles_post_ra>
// kernel: tpu_custom_call.1
= control target key start
LH: loop header
LB: loop body
LE: loop exit
PB: predicated region body
PF: predicated region fallthrough
CT: control target
= control target key end

     0   :  { %13 = vsyncpa [#allocation3], 0  ;;  %s915_s0 = inlined_call_operand.hbm [shape: f32[2,8,32], index: 0, kind: input, shape index: {}]   ;;  %s916_s1 = inlined_call_operand.vmem [shape: f32[2,32], index: 1, kind: input, shape index: {}]   ;;  %s917_s2 = inlined_call_operand.hbm [shape: f32[32,32], index: 2, kind: input, shape index: {}]   ;;  %s918_s3 = inlined_call_operand.vmem [shape: f32[1,32], index: 3, kind: input, shape index: {}]   ;;  %s919_s4 = inlined_call_operand.hbm [shape: f32[32,32], index: 4, kind: input, shape index: {}]   ;;  %s920_s5 = inlined_call_operand.vmem [shape: f32[1,32], index: 5, kind: input, shape index: {}]   ;;  %s921_s6 = inlined_call_operand.hbm [shape: f32[32,32], index: 6, kind: input, shape index: {}]   ;;  %s922_s7 = inlined_call_operand.vmem [shape: f32[1,32], index: 7, kind: input, shape index: {}]   ;;  %s923_s8 = inlined_call_operand.hbm [shape: f32[2,32], index: 8, kind: output, shape index: {}]  }
   0x1   :  { %14 = vsyncpa [#allocation6], 0 }
   0x2   :  { %15 = vsyncpa [#allocation9], 0 }
   0x3   :  { %16 = vsyncpa [#allocation4], 0  ;;  %s730_s27 = smov [#allocation5]   ;;  %s731_s29 = smov [#allocation2]  }
   0x4   :  { %s36_s28 = sshll.u32 %s730_s27, 4  ;;  %s22_s30 = sshll.u32 %s731_s29, 4  ;;  %s37_s28 = int_to_ptr.vmem [resolvable:$true] %s36_s28  ;;  %s787_s30 = int_to_ptr.vmem [resolvable:$true] %s22_s30 }
   0x5   :  { %s612_s11 = scalar_lea.hbm %s917_s2, 512 }
   0x6   :  { %p613_p0 = scmp.ne.s32.totalorder %s917_s2, %s612_s11  ;;  %p616_p1 = scmp.lt.u32.totalorder %s612_s11, %s917_s2 }
   0x8   :  { %p618_p2 = pnand %p616_p1, %p613_p0 }
   0xa   :  { %621 = shalt.err (!%p618_p2)
}
   0xb   :  { %s622_s16 = scalar_lea.vmem %s37_s28, 512  ;;  %p627_p4 = scmp.lt.s32.totalorder %s37_s28, %s37_s28 }
   0xc   :  { %p623_p3 = scmp.ne.s32.totalorder %s37_s28, %s622_s16  ;;  %p628_p5 = scmp.lt.s32.totalorder %s622_s16, %s622_s16 }
   0xe   :  { %p629_p6 = por %p628_p5, %p627_p4 }
  0x10   :  { %p630_p7 = pnand %p629_p6, %p623_p3 }
  0x12   :  { %633 = shalt.err (!%p630_p7)
}
  0x13   :  { %s732_s17 = smov 128   ;;  %s733_s18 = smov 8  }
  0x14   :  { %42 = dma.hbm_to_vmem [thread:$0]  %s917_s2, 512, %s37_s28, [#allocation6], %s732_s17, %s732_s17, %s733_s18  }
  0x15   :  { %s634_s23 = scalar_lea.hbm %s915_s0, 256 }
  0x16   :  { %p635_p8 = scmp.ne.s32.totalorder %s915_s0, %s634_s23  ;;  %p638_p9 = scmp.lt.u32.totalorder %s634_s23, %s915_s0 }
  0x18   :  { %p640_p10 = pnand %p638_p9, %p635_p8 }
  0x1a   :  { %643 = shalt.err (!%p640_p10)
}
  0x1b   :  { %s644_s29 = scalar_lea.vmem %s787_s30, 256  ;;  %p649_p12 = scmp.lt.s32.totalorder %s787_s30, %s787_s30 }
  0x1c   :  { %p645_p11 = scmp.ne.s32.totalorder %s787_s30, %s644_s29  ;;  %p650_p13 = scmp.lt.s32.totalorder %s644_s29, %s644_s29 }
  0x1e   :  { %p651_p0 = por %p650_p13, %p649_p12 }
  0x20   :  { %p652_p1 = pnand %p651_p0, %p645_p11 }
  0x22   :  { %655 = shalt.err (!%p652_p1)
}
  0x23   :  { %28 = dma.hbm_to_vmem [thread:$0]  %s915_s0, 256, %s787_s30, [#allocation3], %s732_s17, %s732_s17, %s733_s18  }
  0x24   :  { %s734_s9 = smov [#allocation7]   ;;  %s735_s11 = smov [#allocation8]  }
  0x25   :  { %s50_s10 = sshll.u32 %s734_s9, 4  ;;  %s64_s12 = sshll.u32 %s735_s11, 4  ;;  %s51_s10 = int_to_ptr.vmem [resolvable:$true] %s50_s10  ;;  %s824_s12 = int_to_ptr.vmem [resolvable:$true] %s64_s12 }
  0x26   :  { %s656_s15 = scalar_lea.hbm %s919_s4, 512 }
  0x27   :  { %p657_p2 = scmp.ne.s32.totalorder %s919_s4, %s656_s15  ;;  %p660_p3 = scmp.lt.u32.totalorder %s656_s15, %s919_s4 }
  0x29   :  { %p662_p4 = pnand %p660_p3, %p657_p2 }
  0x2b   :  { %665 = shalt.err (!%p662_p4)
}
  0x2c   :  { %s666_s0 = scalar_lea.vmem %s51_s10, 512  ;;  %p671_p6 = scmp.lt.s32.totalorder %s51_s10, %s51_s10 }
  0x2d   :  { %p667_p5 = scmp.ne.s32.totalorder %s51_s10, %s666_s0  ;;  %p672_p7 = scmp.lt.s32.totalorder %s666_s0, %s666_s0 }
  0x2f   :  { %p673_p8 = por %p672_p7, %p671_p6 }
  0x31   :  { %p674_p9 = pnand %p673_p8, %p667_p5 }
  0x33   :  { %677 = shalt.err (!%p674_p9)
}
  0x34   :  { %56 = dma.hbm_to_vmem [thread:$0]  %s919_s4, 512, %s51_s10, [#allocation6], %s732_s17, %s732_s17, %s733_s18  }
  0x35   :  { %s678_s25 = scalar_lea.hbm %s921_s6, 512 }
  0x36   :  { %p679_p10 = scmp.ne.s32.totalorder %s921_s6, %s678_s25  ;;  %p682_p11 = scmp.lt.u32.totalorder %s678_s25, %s921_s6 }
  0x38   :  { %p684_p12 = pnand %p682_p11, %p679_p10 }
  0x3a   :  { %687 = shalt.err (!%p684_p12)
}
  0x3b   :  { %s688_s28 = scalar_lea.vmem %s824_s12, 512  ;;  %p693_p0 = scmp.lt.s32.totalorder %s824_s12, %s824_s12 }
  0x3c   :  { %p689_p13 = scmp.ne.s32.totalorder %s824_s12, %s688_s28  ;;  %p694_p1 = scmp.lt.s32.totalorder %s688_s28, %s688_s28 }
  0x3e   :  { %p695_p2 = por %p694_p1, %p693_p0 }
  0x40   :  { %p696_p3 = pnand %p695_p2, %p689_p13 }
  0x42   :  { %699 = shalt.err (!%p696_p3)
}
  0x43   :  { %70 = dma.hbm_to_vmem [thread:$0]  %s921_s6, 512, %s824_s12, [#allocation9], %s732_s17, %s732_s17, %s733_s18  }
  0x44   :  { %722 = dma.done.wait [#allocation3], 256  }
  0x45   :  { %723 = vsyncadd [#allocation3], 4294967040 }
  0x46   :  { %724 = dma.done.wait [#allocation6], 1024  }
  0x47   :  { %725 = vsyncadd [#allocation6], 4294966272 }
  0x48   :  { %726 = dma.done.wait [#allocation9], 512  }
  0x49   :  { %727 = vsyncadd [#allocation9], 4294966784  ;;  %v736_v0 = vmov 0.0|0.0   ;;  %vm737_vm0 = vmmov 0   ;;  %v738_v1 = vmov 0.0   ;;  %v88_v2 = vld [vmem:[#allocation5] sm:$0xff]  ;;  %v355_v19 = vlaneseq }
  0x4a   :  { %570 = vmatprep.subr.bf16.mxu0 %v736_v0  ;;  %545 = vmatprep.mubr.msk.f32.mxu0 %vm737_vm0, %v738_v1  ;;  %v89_v3 = vld [vmem:[#allocation5 + $0x8] sm:$0xff]  ;;  %v92_v4 = vld [vmem:[#allocation7] sm:$0xff]  ;;  %v90_v7 = vld [vmem:[#allocation5 + $0x10] sm:$0xff]  ;;  %vm109_vm1 = vcmask 261120   ;;  %v739_v17 = vmov 1966171168  }
  0x4b   :  { %v571_v5 = vpack.c.bf16 %v89_v3, %v88_v2  ;;  %v93_v6 = vld [vmem:[#allocation7 + $0x8] sm:$0xff]  ;;  %v91_v8 = vld [vmem:[#allocation5 + $0x18] sm:$0xff]  ;;  %v94_v10 = vld [vmem:[#allocation7 + $0x10] sm:$0xff]  ;;  %v353_v18 = vunpack.c.l.s4 %v739_v17  ;;  %v871_v21 = vshrl.u32 %v355_v19, 7  ;;  %v395_v43 = vand.u32 127, %v355_v19 }
  0x4c   :  { %v576_v9 = vpack.c.bf16 %v93_v6, %v92_v4  ;;  %v95_v11 = vld [vmem:[#allocation7 + $0x18] sm:$0xff]  ;;  %v574_v12 = vpack.c.bf16 %v91_v8, %v90_v7  ;;  %v85_v14 = vld [vmem:[#allocation2] sm:$0xff]  ;;  %vm404_vm2 = vcmask 1041409   ;;  %vm407_vm3 = vcmask 58368   ;;  %v96_v62 = vld [vmem:[#allocation8] sm:$0xff] }
  0x4d   :  { %572 = vmatpush3.bf16.msra.mxu0 %v571_v5  ;;  %v580_v13 = vpack.c.bf16 %v95_v11, %v94_v10  ;;  %556 = vmatprep.mubr.msk.f32.mxu1 %vm109_vm1, %v85_v14  ;;  %v87_v15 = vld [vmem:[%s916_s1] sm:$0x3]  ;;  %v865_v16 = vld [vmem:[#allocation2 + $0x8] sm:$0xff]  ;;  %v354_v20 = vunpack.c.0.s8 %v353_v18  ;;  %v881_v31 = vsub.s32 0, %v871_v21  ;;  %v398_v45 = vsub.s32 %v395_v43, %v871_v21  ;;  %v97_v63 = vld [vmem:[#allocation8 + $0x8] sm:$0xff] }
  0x4e   :  { %573 = vmatprep.subr.bf16.mxu0 %v736_v0  ;;  %577 = vmatprep.subr.bf16.mxu1 %v576_v9  ;;  %v512_v22 = vld [vmem:[%s918_s3] ss:$0 sm:$0xff]  ;;  %v740_v51 = vmov 0   ;;  %v418_v52 = vsub.s32 1, %v871_v21  ;;  %v584_v1 = vpack.c.bf16 %v97_v63, %v96_v62  ;;  %v99_v2 = vld [vmem:[#allocation8 + $0x18] sm:$0xff]  ;;  %vm493_vm4 = vcmask 254976  }
  0x4f   :  { %579 = vmatpush3.bf16.msra.mxu1 %v576_v9  ;;  %v357_v23 = vsub.s32 %v354_v20, %v871_v21  ;;  %v514_v28 = vld [vmem:[%s920_s5] ss:$0 sm:$0xff]  ;;  %605 = vset.pattern.permute.xlu0 %v740_v51 }
  0x50   :  { %581 = vmatprep.subr.bf16.mxu1 %v580_v13  ;;  %604 = vset.pattern.permute.xlu1 %v740_v51  ;;  %v98_v0 = vld [vmem:[#allocation8 + $0x10] sm:$0xff] }
  0x51   :  { %575 = vmatpush3.bf16.msra.mxu0 %v574_v12  ;;  %v588_v3 = vpack.c.bf16 %v99_v2, %v98_v0  ;;  %v517_v18 = vld [vmem:[%s922_s7] ss:$0 sm:$0xff]  ;;  %s741_s7 = smov [#allocation10]  }
  0x52   :  { %585 = vmatprep.subr.bf16.mxu0 %v584_v1  ;;  %s501_s12 = sshll.u32 %s741_s7, 4  ;;  %s502_s12 = int_to_ptr.vmem [resolvable:$true] %s501_s12 }
  0x53   :  { %583 = vmatpush3.bf16.msra.mxu1 %v580_v13  ;;  %s700_s13 = scalar_lea.vmem %s502_s12, 32  ;;  %p705_p5 = scmp.lt.s32.totalorder %s502_s12, %s502_s12 }
  0x54   :  { %546 = vmatmul.mubr.msk.f32.vlgmr.msra.gmra.mrb[0].mxu0 %vm109_vm1, %v87_v15  ;;  %p701_p4 = scmp.ne.s32.totalorder %s502_s12, %s700_s13  ;;  %p706_p6 = scmp.lt.s32.totalorder %s700_s13, %s700_s13 }
  0x55   :  { %567 = vmatprep.mubr.msk.f32.mxu0 %vm109_vm1, %v85_v14  ;;  %587 = vmatpush3.bf16.msra.mxu0 %v584_v1 }
  0x56   :  { %557 = vmatmul.mubr.msk.f32.vlgmr.msra.gmra.mrb[0].mxu1 %vm109_vm1, %v865_v16  ;;  %589 = vmatprep.subr.bf16.mxu0 %v588_v3  ;;  %p707_p7 = por %p706_p6, %p705_p5 }
  0x58   :  { %p708_p8 = pnand %p707_p7, %p701_p4 }
  0x59   :  { %591 = vmatpush3.bf16.msra.mxu0 %v588_v3 }
  0x5c   :  { %568 = vmatmul.mubr.msk.f32.vlgmr.msra.gmra.mrb[2].mxu0 %vm109_vm1, %v865_v16 }
 0x127   :  { %v179_v24 = vpop.f32.mrb[0].mxu0 }
 0x128   :  { %v180_v25 = vadd.f32 %v512_v22, %v179_v24  ;;  %v547_v26 = vpop.f32.mrb[1].mxu0 }
 0x129   :  { %v558_v27 = vpop.f32.mrb[0].mxu1 }
 0x12a   :  { %v358_v29 = vrot.slane %v180_v25, %v357_v23  ;;  %v261_v30 = vpop.f32.mrb[1].mxu1  ;;  %v267_v37 = vadd.f32 %v558_v27, %v514_v28 }
 0x12b   :  { %v262_v34 = vadd.f32 %v514_v28, %v261_v30 }
 0x12c   :  { %v359_v32 = vcombine.high %v358_v29, %v358_v29  ;;  %v366_v33 = vrot.slane %v358_v29, %v357_v23 }
 0x12e   :  { %v377_v35 = vrot.slane %v366_v33, %v881_v31  ;;  %v373_v36 = vrot.slane %v359_v32, %v357_v23 }
 0x12f   :  { %v569_v10 = vpop.f32.mrb[2].mxu0 }
 0x130   :  { %v384_v38 = vmul.f32 %v377_v35, %v262_v34  ;;  %v381_v39 = vrot.slane %v373_v36, %v881_v31  ;;  %v342_v11 = vpop.f32.mrb[3].mxu0  ;;  %v348_v21 = vadd.f32 %v569_v10, %v517_v18 }
 0x131   :  { %v343_v19 = vadd.f32 %v517_v18, %v342_v11 }
 0x132   :  { %v386_v40 = vsel %vm109_vm1, %v384_v38, 0.0  ;;  %v385_v41 = vmul.f32 %v381_v39, %v267_v37 }
 0x133   :  { %387 = vadd.xlane.f32.xlu0 %v386_v40 }
 0x134   :  { %v389_v42 = vsel %vm109_vm1, %v385_v41, 0.0 }
 0x137   :  { %390 = vadd.xlane.f32.xlu0 %v389_v42 }
 0x1c0   :  { %v388_v44 = vpop.xlane.xlu0 %387 }
 0x1c1   :  { %v399_v47 = vrot.slane %v388_v44, %v398_v45 }
 0x1c4   :  { %v391_v46 = vpop.xlane.xlu0 %390 }
 0x1c5   :  { %v403_v48 = vrot.slane %v391_v46, %v398_v45 }
 0x1c7   :  { %v405_v49 = vsel %vm404_vm2, %v403_v48, %v399_v47 }
 0x1c8   :  { %v408_v50 = vsel %vm407_vm3, %v405_v49, -inf }
 0x1c9   :  { %409 = vmax.xlane.f32.xlu1 %v408_v50 }
 0x256   :  { %v410_v53 = vpop.xlane.xlu1 %409 }
 0x257   :  { %v415_v54 = vrot.slane %v410_v53, %v881_v31  ;;  %v419_v55 = vrot.slane %v410_v53, %v418_v52 }
 0x259   :  { %v422_v56 = vsub.f32 %v388_v44, %v415_v54  ;;  %v423_v57 = vsub.f32 %v391_v46, %v419_v55 }
 0x25b   :  { %v424_v58 = vmul.f32 1.442695, %v422_v56  ;;  %v426_v59 = vmul.f32 1.442695, %v423_v57 }
 0x25d   :  { %606 = vpow2.f32 %v424_v58 }
 0x25e   :  { %608 = vpow2.f32 %v426_v59 }
 0x267   :  { %v607_v60 = vpop.eup %606 }
 0x268   :  { %v609_v61 = vpop.eup %608  ;;  %431 = vperm.xlu1 %604, %v607_v60  }
 0x269   :  { %434 = vperm.xlu0 %605, %v609_v61  }
 0x2e7   :  { %v432_v4 = vpop.permute.xlu1 %431 }
 0x2e8   :  { %v435_v5 = vpop.permute.xlu0 %434  ;;  %v439_v6 = vrot.slane %v432_v4, %v398_v45 }
 0x2e9   :  { %v443_v7 = vrot.slane %v435_v5, %v398_v45 }
 0x2eb   :  { %v444_v8 = vsel %vm404_vm2, %v443_v7, %v439_v6 }
 0x2ec   :  { %v446_v9 = vsel %vm407_vm3, %v444_v8, 0.0 }
 0x2ed   :  { %447 = vadd.xlane.f32.xlu1 %v446_v9 }
 0x37a   :  { %v448_v12 = vpop.xlane.xlu1 %447 }
 0x37b   :  { %610 = vrcp.f32 %v448_v12 }
 0x385   :  { %v611_v13 = vpop.eup %610 }
 0x386   :  { %v454_v14 = vrot.slane %v611_v13, %v881_v31  ;;  %v458_v17 = vrot.slane %v611_v13, %v418_v52 }
 0x388   :  { %v461_v15 = vmul.f32 %v607_v60, %v454_v14  ;;  %v462_v16 = vmul.f32 %v609_v61, %v458_v17 }
 0x38a   :  { %465 = vperm.xlu0 %605, %v461_v15  }
 0x38e   :  { %470 = vperm.xlu0 %605, %v462_v16  }
 0x409   :  { %v466_v20 = vpop.permute.xlu0 %465 }
 0x40a   :  { %v473_v22 = vmul.f32 %v466_v20, %v343_v19 }
 0x40c   :  { %v475_v23 = vsel %vm109_vm1, %v473_v22, 0.0 }
 0x40d   :  { %v476_v24 = vrot.slane %v475_v23, 4  ;;  %v471_v25 = vpop.permute.xlu0 %470 }
 0x40e   :  { %v474_v26 = vmul.f32 %v471_v25, %v348_v21 }
 0x40f   :  { %v477_v27 = vadd.f32 %v476_v24, %v475_v23 }
 0x410   :  { %v482_v28 = vsel %vm109_vm1, %v474_v26, 0.0 }
 0x411   :  { %v478_v29 = vrot.slane %v477_v27, 2  ;;  %v483_v30 = vrot.slane %v482_v28, 4 }
 0x413   :  { %v479_v31 = vadd.f32 %v478_v29, %v477_v27  ;;  %v484_v32 = vadd.f32 %v483_v30, %v482_v28 }
 0x415   :  { %v485_v33 = vrot.slane %v484_v32, 2  ;;  %v480_v34 = vrot.slane %v479_v31, 1 }
 0x417   :  { %v486_v35 = vadd.f32 %v485_v33, %v484_v32  ;;  %v481_v37 = vadd.f32 %v480_v34, %v479_v31 }
 0x419   :  { %v487_v36 = vrot.slane %v486_v35, 1 }
 0x41b   :  { %v488_v38 = vadd.f32 %v487_v36, %v486_v35 }
 0x41d   :  { %v491_v39 = vsel %vm404_vm2, %v488_v38, %v481_v37 }
 0x41e   :  { %494 = vst.msk [vmem:[#allocation10] sm:$0x3] %vm493_vm4, %v491_v39 }
 0x41f   :  { %711 = shalt.err (!%p708_p8)
}
 0x420   :  { %s712_s16 = scalar_lea.hbm %s923_s8, 32 }
 0x421   :  { %p713_p9 = scmp.ne.s32.totalorder %s923_s8, %s712_s16  ;;  %p716_p10 = scmp.lt.u32.totalorder %s712_s16, %s923_s8 }
 0x423   :  { %p718_p11 = pnand %p716_p10, %p713_p9 }
 0x425   :  { %721 = shalt.err (!%p718_p11)
}
 0x426   :  { %504 = dma.vmem_to_hbm [thread:$0]  %s502_s12, 32, %s923_s8, [#allocation4]  }
 0x427   :  { %728 = dma.done.wait [#allocation4], 32  }
 0x428   :  { %729 = vsyncadd [#allocation4], 4294967264 }
 0x429   :  { %508 = vsyncpa [#allocation3], 1 }
 0x42a   :  { %509 = vsyncpa [#allocation6], 1 }
 0x42b   :  { %510 = vsyncpa [#allocation9], 1 }
 0x42c   :  { %511 = vsyncpa [#allocation4], 1 }

</bundles_post_ra>
